<compile_context>
chip_gen: v7x
topology: tpu7x:2x2x1
jax: 0.10.0
libtpu: 0.0.40
codegen_flags: <defaults>
</compile_context>

<pallas_src>
import jax
import jax.numpy as jnp
from jax.experimental import pallas as pl
from jax.experimental.pallas import tpu as pltpu


def _pair_indices(num_feature_field):
    row, col = [], []
    for i in range(num_feature_field - 1):
        for j in range(i + 1, num_feature_field):
            row.append(i)
            col.append(j)
    return row, col


def _round_up(x, m):
    return ((x + m - 1) // m) * m


def _make_kernel(row, col, num_feature_field, embedding_size):
    F, E = num_feature_field, embedding_size

    def kernel(x_ref, w_ref, o_ref):
        # Slice each field lazily from the VMEM tile (input dtype, no eager
        # f32 copies); pair products stay on the VPU.
        fields = [x_ref[:, i * E:(i + 1) * E] for i in range(F)]
        # Lane-concatenated pair products: (TB, P*E).
        pq = jnp.concatenate(
            [fields[i] * fields[j] for i, j in zip(row, col)], axis=-1)
        # Reduce over E on the MXU with the resident block-diagonal-ones
        # matrix: (TB, P*E) @ (P*E, NP) -> (TB, NP), f32 accumulation.
        # Columns P..NP-1 of w are zero, so padded output lanes stay zero.
        o_ref[...] = jnp.dot(
            pq, w_ref[...], preferred_element_type=jnp.float32
        ).astype(o_ref.dtype)

    return kernel


def inner_product_layer(feat_emb, num_feature_field, *, batch_tile=None):
    """Pallas equivalent of InnerProductLayer.forward.

    Args:
      feat_emb: [batch, num_feature_field, embedding_size]
    Returns:
      [batch, num_pairs] with num_pairs = F*(F-1)/2
    """
    B, F, E = feat_emb.shape
    assert F == num_feature_field
    row, col = _pair_indices(F)
    P = len(row)
    FE = F * E
    NP = max(128, _round_up(P, 128))      # lane-dense padded pairs axis
    dtype = feat_emb.dtype
    itemsize = jnp.dtype(dtype).itemsize

    # Free reshape: lane-dense (B, F*E) input tile, no (8,128) field padding.
    x2 = feat_emb.reshape(B, FE)

    # Block-diagonal-ones reduction matrix: w[k*E + e, k] = 1, zero elsewhere
    # (columns P..NP-1 all zero). Built once in the wrapper, VMEM-resident in
    # the kernel via a constant index_map.
    w = jnp.repeat(jnp.eye(P, NP, dtype=dtype), E, axis=0)   # (P*E, NP)

    # Batch tile: big enough to approach the HBM roofline, small enough that
    # (double-buffered input + padded output + pair-product intermediate +
    # f32 accumulator) fits well inside the explicit 32 MiB VMEM limit on all
    # generations, and capped so the grid keeps >=4 steps for v7x megacore.
    if batch_tile is None:
        if B <= 8:
            batch_tile = B              # single full-extent block
        else:
            bytes_per_row = (FE * itemsize * 2       # input, double-buffered
                             + NP * itemsize * 2     # padded out, double-buf
                             + P * E * itemsize      # pq intermediate
                             + NP * 4)               # f32 matmul accumulator
            tb = (12 * 1024 * 1024) // max(bytes_per_row, 1)
            tb = max(8, min(tb, 2048))
            tb = min(tb, max(8, _round_up((B + 3) // 4, 8)))  # >=4 grid steps
            batch_tile = max(8, (tb // 8) * 8)
    TB = batch_tile

    kernel = _make_kernel(row, col, F, E)

    out = pl.pallas_call(
        kernel,
        out_shape=jax.ShapeDtypeStruct((B, NP), dtype),
        grid=(pl.cdiv(B, TB),),
        in_specs=[
            pl.BlockSpec((TB, FE), lambda b: (b, 0)),
            pl.BlockSpec((P * E, NP), lambda b: (0, 0)),   # resident constant
        ],
        out_specs=pl.BlockSpec((TB, NP), lambda b: (b, 0)),
        compiler_params=pltpu.CompilerParams(
            dimension_semantics=("parallel",),
            vmem_limit_bytes=32 * 1024 * 1024,
        ),
    )(x2, w)

    # Drop the zero-padded lanes; real pairs live in columns [0, P).
    return out[:, :P]


def _reference(feat_emb, num_feature_field):
    row, col = _pair_indices(num_feature_field)
    p = feat_emb[:, jnp.array(row), :]
    q = feat_emb[:, jnp.array(col), :]
    return jnp.sum(p * q, axis=-1)


if __name__ == "__main__":
    batch = 8
    num_feature_field = 6      # -> num_pairs = 15
    embedding_size = 32

    key = jax.random.PRNGKey(0)
    feat_emb = jax.random.normal(
        key, (batch, num_feature_field, embedding_size), dtype=jnp.float32
    )

    out = inner_product_layer(feat_emb, num_feature_field)
    out = jax.block_until_ready(out)

    ref = _reference(feat_emb, num_feature_field)
    num_pairs = num_feature_field * (num_feature_field - 1) // 2
    assert out.shape == (batch, num_pairs), out.shape
    assert jnp.allclose(out, ref, atol=1e-5, rtol=1e-5)

    print("KERNEL_OK")
</pallas_src>

<mosaic_0001>
module attributes {stable_mosaic.version = 11 : i64} {
  func.func @kernel(%arg0: i32, %arg1: memref<8x192xf32, #tpu.memory_space<vmem>>, %arg2: memref<480x128xf32, #tpu.memory_space<vmem>>, %arg3: memref<8x128xf32, #tpu.memory_space<vmem>>) attributes {dimension_semantics = [#tpu.dimension_semantics<parallel>], iteration_bounds = array<i64: 1>, scalar_prefetch = 0 : i64, scratch_operands = 0 : i64, tpu.core_type = #tpu.core_type<tc>, window_params = [{transform_indices = @transform_0, window_bounds = array<i64: 8, 192>}, {pipeline_mode = #tpu.pipeline_mode<synchronous>, transform_indices = @transform_1, window_bounds = array<i64: 480, 128>}, {transform_indices = @transform_2, window_bounds = array<i64: 8, 128>}]} {
    %c0 = arith.constant 0 : index
    %c0_0 = arith.constant 0 : index
    %0 = vector.load %arg1[%c0, %c0_0] : memref<8x192xf32, #tpu.memory_space<vmem>>, vector<8x32xf32>
    %c0_1 = arith.constant 0 : index
    %c32 = arith.constant 32 : index
    %1 = vector.load %arg1[%c0_1, %c32] : memref<8x192xf32, #tpu.memory_space<vmem>>, vector<8x32xf32>
    %c0_2 = arith.constant 0 : index
    %c64 = arith.constant 64 : index
    %2 = vector.load %arg1[%c0_2, %c64] : memref<8x192xf32, #tpu.memory_space<vmem>>, vector<8x32xf32>
    %c0_3 = arith.constant 0 : index
    %c96 = arith.constant 96 : index
    %3 = vector.load %arg1[%c0_3, %c96] : memref<8x192xf32, #tpu.memory_space<vmem>>, vector<8x32xf32>
    %c0_4 = arith.constant 0 : index
    %c128 = arith.constant 128 : index
    %4 = vector.load %arg1[%c0_4, %c128] : memref<8x192xf32, #tpu.memory_space<vmem>>, vector<8x32xf32>
    %c0_5 = arith.constant 0 : index
    %c160 = arith.constant 160 : index
    %5 = vector.load %arg1[%c0_5, %c160] : memref<8x192xf32, #tpu.memory_space<vmem>>, vector<8x32xf32>
    %6 = arith.mulf %0, %1 : vector<8x32xf32>
    %7 = arith.mulf %0, %2 : vector<8x32xf32>
    %8 = arith.mulf %0, %3 : vector<8x32xf32>
    %9 = arith.mulf %0, %4 : vector<8x32xf32>
    %10 = arith.mulf %0, %5 : vector<8x32xf32>
    %11 = arith.mulf %1, %2 : vector<8x32xf32>
    %12 = arith.mulf %1, %3 : vector<8x32xf32>
    %13 = arith.mulf %1, %4 : vector<8x32xf32>
    %14 = arith.mulf %1, %5 : vector<8x32xf32>
    %15 = arith.mulf %2, %3 : vector<8x32xf32>
    %16 = arith.mulf %2, %4 : vector<8x32xf32>
    %17 = arith.mulf %2, %5 : vector<8x32xf32>
    %18 = arith.mulf %3, %4 : vector<8x32xf32>
    %19 = arith.mulf %3, %5 : vector<8x32xf32>
    %20 = arith.mulf %4, %5 : vector<8x32xf32>
    %21 = tpu.concatenate %6, %7, %8, %9, %10, %11, %12, %13, %14, %15, %16, %17, %18, %19, %20 in 1 : vector<8x32xf32>, vector<8x32xf32>, vector<8x32xf32>, vector<8x32xf32>, vector<8x32xf32>, vector<8x32xf32>, vector<8x32xf32>, vector<8x32xf32>, vector<8x32xf32>, vector<8x32xf32>, vector<8x32xf32>, vector<8x32xf32>, vector<8x32xf32>, vector<8x32xf32>, vector<8x32xf32> -> vector<8x480xf32>
    %c0_6 = arith.constant 0 : index
    %c0_7 = arith.constant 0 : index
    %22 = vector.load %arg2[%c0_6, %c0_7] : memref<480x128xf32, #tpu.memory_space<vmem>>, vector<480x128xf32>
    %cst = arith.constant dense<0.000000e+00> : vector<8x128xf32>
    %23 = tpu.matmul %21, %22, %cst {dimension_numbers = #tpu.dot_dimension_numbers<[1], [0], [0], [1], [0, 0, 1, 1], [], []>} : vector<8x480xf32>, vector<480x128xf32>, vector<8x128xf32> -> vector<8x128xf32>
    %c0_8 = arith.constant 0 : index
    %c0_9 = arith.constant 0 : index
    %24 = vector.load %arg3[%c0_8, %c0_9] : memref<8x128xf32, #tpu.memory_space<vmem>>, vector<8x128xf32>
    tpu.vector_store %arg3[%c0_8, %c0_9], %23 {strides = array<i32>} : memref<8x128xf32, #tpu.memory_space<vmem>>, vector<8x128xf32>,
    return
  }
  func.func @transform_0(%arg0: i32) -> (i32, i32) {
    %c0_i32 = arith.constant 0 : i32
    %c0_i32_0 = arith.constant 0 : i32
    return %arg0, %c0_i32 : i32, i32
  }
  func.func @transform_1(%arg0: i32) -> (i32, i32) {
    %c0_i32 = arith.constant 0 : i32
    %c0_i32_0 = arith.constant 0 : i32
    %c0_i32_1 = arith.constant 0 : i32
    return %c0_i32, %c0_i32_0 : i32, i32
  }
  func.func @transform_2(%arg0: i32) -> (i32, i32) {
    %c0_i32 = arith.constant 0 : i32
    %c0_i32_0 = arith.constant 0 : i32
    return %arg0, %c0_i32 : i32, i32
  }
}

</mosaic_0001>

<bundles_post_ra>
// kernel: tpu_custom_call.1
= control target key start
LH: loop header
LB: loop body
LE: loop exit
PB: predicated region body
PF: predicated region fallthrough
CT: control target
= control target key end

     0   :  { %7 = vsyncpa [#allocation3], 0  ;;  %s663_s0 = inlined_call_operand.hbm [shape: f32[8,192], index: 0, kind: input, shape index: {}]   ;;  %s664_s1 = inlined_call_operand.hbm [shape: f32[480,128], index: 1, kind: input, shape index: {}]   ;;  %s665_s2 = inlined_call_operand.hbm [shape: f32[8,128], index: 2, kind: output, shape index: {}]  }
   0x1   :  { %8 = vsyncpa [#allocation6], 0 }
   0x2   :  { %9 = vsyncpa [#allocation4], 0  ;;  %s538_s9 = smov [#allocation2]   ;;  %s539_s11 = smov [#allocation5]  }
   0x3   :  { %s16_s10 = sshll.u32 %s538_s9, 4  ;;  %s25_s12 = sshll.u32 %s539_s11, 4  ;;  %s17_s10 = int_to_ptr.vmem [resolvable:$true] %s16_s10  ;;  %s562_s12 = int_to_ptr.vmem [resolvable:$true] %s25_s12 }
   0x4   :  { %s466_s15 = scalar_lea.hbm %s663_s0, 256 }
   0x5   :  { %p467_p0 = scmp.ne.s32.totalorder %s663_s0, %s466_s15  ;;  %p470_p1 = scmp.lt.u32.totalorder %s466_s15, %s663_s0 }
   0x7   :  { %p472_p2 = pnand %p470_p1, %p467_p0 }
   0x9   :  { %475 = shalt.err (!%p472_p2)
}
   0xa   :  { %s476_s20 = scalar_lea.vmem %s17_s10, 256  ;;  %p481_p4 = scmp.lt.s32.totalorder %s17_s10, %s17_s10 }
   0xb   :  { %p477_p3 = scmp.ne.s32.totalorder %s17_s10, %s476_s20  ;;  %p482_p5 = scmp.lt.s32.totalorder %s476_s20, %s476_s20 }
   0xd   :  { %p483_p6 = por %p482_p5, %p481_p4 }
   0xf   :  { %p484_p7 = pnand %p483_p6, %p477_p3 }
  0x11   :  { %487 = shalt.err (!%p484_p7)
}
  0x12   :  { %19 = dma.hbm_to_vmem [thread:$0]  %s663_s0, 256, %s17_s10, [#allocation3]  }
  0x13   :  { %s488_s25 = scalar_lea.hbm %s664_s1, 7680 }
  0x14   :  { %p489_p8 = scmp.ne.s32.totalorder %s664_s1, %s488_s25  ;;  %p492_p9 = scmp.lt.u32.totalorder %s488_s25, %s664_s1 }
  0x16   :  { %p494_p10 = pnand %p492_p9, %p489_p8 }
  0x18   :  { %497 = shalt.err (!%p494_p10)
}
  0x19   :  { %s498_s30 = scalar_lea.vmem %s562_s12, 7680  ;;  %p503_p12 = scmp.lt.s32.totalorder %s562_s12, %s562_s12 }
  0x1a   :  { %p499_p11 = scmp.ne.s32.totalorder %s562_s12, %s498_s30  ;;  %p504_p13 = scmp.lt.s32.totalorder %s498_s30, %s498_s30 }
  0x1c   :  { %p505_p0 = por %p504_p13, %p503_p12 }
  0x1e   :  { %p506_p1 = pnand %p505_p0, %p499_p11 }
  0x20   :  { %509 = shalt.err (!%p506_p1)
}
  0x21   :  { %s540_s0 = smov 128   ;;  %s541_s3 = smov 8  }
  0x22   :  { %31 = dma.hbm_to_vmem [thread:$0]  %s664_s1, 7680, %s562_s12, [#allocation6], %s540_s0, %s540_s0, %s541_s3  }
  0x23   :  { %532 = dma.done.wait [#allocation3], 256  }
  0x24   :  { %533 = vsyncadd [#allocation3], 4294967040 }
  0x25   :  { %534 = dma.done.wait [#allocation6], 7680  }
  0x26   :  { %535 = vsyncadd [#allocation6], 4294959616  ;;  %v593_v0 = vld [vmem:[#allocation2 + $0x8] sm:$0xff]  ;;  %v595_v1 = vld [vmem:[#allocation2] sm:$0xff]  ;;  %s542_s6 = smov 32   ;;  %s543_s7 = smov 64  }
  0x27   :  { %59 = vrot.lane.b32.xlu1 %v593_v0, %s542_s6  ;;  %45 = vrot.lane.b32.xlu0 %v595_v1, %s543_s7  ;;  %v149_v2 = vld [vmem:[#allocation5 + $0x100] sm:$0xff]  ;;  %v150_v3 = vld [vmem:[#allocation5 + $0x108] sm:$0xff]  ;;  %v151_v4 = vld [vmem:[#allocation5 + $0x110] sm:$0xff]  ;;  %s544_s1 = smov 96   ;;  %v545_v7 = vmov 0.0|0.0   ;;  %vm103_vm0 = vcmask 261120  }
  0x28   :  { %v406_v5 = vpack.c.bf16 %v150_v3, %v149_v2  ;;  %v152_v6 = vld [vmem:[#allocation5 + $0x118] sm:$0xff]  ;;  %405 = vmatprep.subr.bf16.mxu1 %v545_v7  ;;  %v153_v9 = vld [vmem:[#allocation5 + $0x120] sm:$0xff]  ;;  %v134_v11 = vld [vmem:[#allocation5 + $0x88] sm:$0xff]  ;;  %vm105_vm1 = vcmask 523264   ;;  %vm107_vm2 = vcmask 785408   ;;  %s546_s8 = smov [#allocation7]  }
  0x29   :  { %v409_v8 = vpack.c.bf16 %v152_v6, %v151_v4  ;;  %v133_v10 = vld [vmem:[#allocation5 + $0x80] sm:$0xff]  ;;  %v154_v12 = vld [vmem:[#allocation5 + $0x128] sm:$0xff]  ;;  %v135_v17 = vld [vmem:[#allocation5 + $0x90] sm:$0xff]  ;;  %s327_s9 = sshll.u32 %s546_s8, 4  ;;  %s328_s9 = int_to_ptr.vmem [resolvable:$true] %s327_s9 }
  0x2a   :  { %407 = vmatpush1.bf16.msra.mxu1 %v406_v5  ;;  %v373_v13 = vpack.c.bf16 %v134_v11, %v133_v10  ;;  %v117_v14 = vld [vmem:[#allocation5] sm:$0xff]  ;;  %v118_v15 = vld [vmem:[#allocation5 + $0x8] sm:$0xff]  ;;  %v136_v18 = vld [vmem:[#allocation5 + $0x98] sm:$0xff]  ;;  %v412_v22 = vpack.c.bf16 %v154_v12, %v153_v9  ;;  %s510_s10 = scalar_lea.vmem %s328_s9, 128  ;;  %p515_p3 = scmp.lt.s32.totalorder %s328_s9, %s328_s9 }
  0x2b   :  { %41 = vrot.lane.b32.xlu1 %v595_v1, %s544_s1  ;;  %49 = vrot.lane.b32.xlu0 %v595_v1, %s542_s6  ;;  %v375_v16 = vpack.c.bf16 %v118_v15, %v117_v14  ;;  %v377_v19 = vpack.c.bf16 %v136_v18, %v135_v17  ;;  %v119_v20 = vld [vmem:[#allocation5 + $0x10] sm:$0xff]  ;;  %v120_v21 = vld [vmem:[#allocation5 + $0x18] sm:$0xff]  ;;  %v137_v25 = vld [vmem:[#allocation5 + $0xa0] sm:$0xff]  ;;  %p511_p2 = scmp.ne.s32.totalorder %s328_s9, %s510_s10  ;;  %p516_p4 = scmp.lt.s32.totalorder %s510_s10, %s510_s10 }
  0x2c   :  { %408 = vmatprep.subr.bf16.mxu1 %v545_v7  ;;  %374 = vmatprep.subr.bf16.mxu0 %v373_v13  ;;  %v155_v23 = vld [vmem:[#allocation5 + $0x130] sm:$0xff]  ;;  %v379_v24 = vpack.c.bf16 %v120_v21, %v119_v20  ;;  %v138_v26 = vld [vmem:[#allocation5 + $0xa8] sm:$0xff]  ;;  %v156_v27 = vld [vmem:[#allocation5 + $0x138] sm:$0xff] }
  0x2d   :  { %376 = vmatpush3.bf16.msra.mxu0 %v375_v16  ;;  %v381_v28 = vpack.c.bf16 %v138_v26, %v137_v25  ;;  %v121_v29 = vld [vmem:[#allocation5 + $0x20] sm:$0xff]  ;;  %v122_v30 = vld [vmem:[#allocation5 + $0x28] sm:$0xff]  ;;  %v139_v31 = vld [vmem:[#allocation5 + $0xb0] sm:$0xff]  ;;  %v415_v33 = vpack.c.bf16 %v156_v27, %v155_v23  ;;  %p517_p5 = por %p516_p4, %p515_p3 }
  0x2e   :  { %410 = vmatpush1.bf16.msra.mxu1 %v409_v8  ;;  %378 = vmatprep.subr.bf16.mxu0 %v377_v19  ;;  %v140_v32 = vld [vmem:[#allocation5 + $0xb8] sm:$0xff]  ;;  %v157_v34 = vld [vmem:[#allocation5 + $0x140] sm:$0xff]  ;;  %v383_v35 = vpack.c.bf16 %v122_v30, %v121_v29  ;;  %v158_v36 = vld [vmem:[#allocation5 + $0x148] sm:$0xff] }
  0x2f   :  { %55 = vrot.lane.b32.xlu0 %v593_v0, %s544_s1  ;;  %63 = vrot.lane.b32.xlu1 %v593_v0, %s543_s7  ;;  %v385_v37 = vpack.c.bf16 %v140_v32, %v139_v31  ;;  %v123_v38 = vld [vmem:[#allocation5 + $0x30] sm:$0xff]  ;;  %v124_v39 = vld [vmem:[#allocation5 + $0x38] sm:$0xff]  ;;  %v141_v40 = vld [vmem:[#allocation5 + $0xc0] sm:$0xff]  ;;  %v418_v42 = vpack.c.bf16 %v158_v36, %v157_v34  ;;  %p518_p6 = pnand %p517_p5, %p511_p2 }
  0x30   :  { %411 = vmatprep.subr.bf16.mxu1 %v545_v7  ;;  %v142_v41 = vld [vmem:[#allocation5 + $0xc8] sm:$0xff]  ;;  %v159_v43 = vld [vmem:[#allocation5 + $0x150] sm:$0xff]  ;;  %v387_v44 = vpack.c.bf16 %v124_v39, %v123_v38  ;;  %v160_v45 = vld [vmem:[#allocation5 + $0x158] sm:$0xff] }
  0x31   :  { %380 = vmatpush3.bf16.msra.mxu0 %v379_v24  ;;  %v389_v46 = vpack.c.bf16 %v142_v41, %v141_v40  ;;  %v125_v47 = vld [vmem:[#allocation5 + $0x40] sm:$0xff]  ;;  %v126_v48 = vld [vmem:[#allocation5 + $0x48] sm:$0xff]  ;;  %v143_v49 = vld [vmem:[#allocation5 + $0xd0] sm:$0xff]  ;;  %v421_v51 = vpack.c.bf16 %v160_v45, %v159_v43 }
  0x32   :  { %413 = vmatpush1.bf16.msra.mxu1 %v412_v22  ;;  %382 = vmatprep.subr.bf16.mxu0 %v381_v28  ;;  %v144_v50 = vld [vmem:[#allocation5 + $0xd8] sm:$0xff]  ;;  %v161_v52 = vld [vmem:[#allocation5 + $0x160] sm:$0xff]  ;;  %v391_v53 = vpack.c.bf16 %v126_v48, %v125_v47  ;;  %v162_v54 = vld [vmem:[#allocation5 + $0x168] sm:$0xff] }
  0x33   :  { %414 = vmatprep.subr.bf16.mxu1 %v545_v7  ;;  %v393_v55 = vpack.c.bf16 %v144_v50, %v143_v49  ;;  %v127_v56 = vld [vmem:[#allocation5 + $0x50] sm:$0xff]  ;;  %v128_v57 = vld [vmem:[#allocation5 + $0x58] sm:$0xff]  ;;  %v424_v58 = vpack.c.bf16 %v162_v54, %v161_v52  ;;  %v165_v63 = vld [vmem:[#allocation5 + $0x180] sm:$0xff] }
  0x34   :  { %v395_v59 = vpack.c.bf16 %v128_v57, %v127_v56  ;;  %v163_v60 = vld [vmem:[#allocation5 + $0x170] sm:$0xff]  ;;  %v164_v61 = vld [vmem:[#allocation5 + $0x178] sm:$0xff]  ;;  %v166_v2 = vld [vmem:[#allocation5 + $0x188] sm:$0xff] }
  0x35   :  { %384 = vmatpush3.bf16.msra.mxu0 %v383_v35  ;;  %v427_v62 = vpack.c.bf16 %v164_v61, %v163_v60  ;;  %v430_v3 = vpack.c.bf16 %v166_v2, %v165_v63  ;;  %v167_v4 = vld [vmem:[#allocation5 + $0x190] sm:$0xff]  ;;  %v168_v5 = vld [vmem:[#allocation5 + $0x198] sm:$0xff]  ;;  %v169_v8 = vld [vmem:[#allocation5 + $0x1a0] sm:$0xff]  ;;  %v53_v35 = vmul.f32 %v593_v0, %v595_v1 }
  0x36   :  { %416 = vmatpush1.bf16.msra.mxu1 %v415_v33  ;;  %386 = vmatprep.subr.bf16.mxu0 %v385_v37  ;;  %v433_v6 = vpack.c.bf16 %v168_v5, %v167_v4  ;;  %v170_v9 = vld [vmem:[#allocation5 + $0x1a8] sm:$0xff]  ;;  %v145_v11 = vld [vmem:[#allocation5 + $0xe0] sm:$0xff]  ;;  %v171_v16 = vld [vmem:[#allocation5 + $0x1b0] sm:$0xff] }
  0x37   :  { %417 = vmatprep.subr.bf16.mxu1 %v545_v7  ;;  %v436_v10 = vpack.c.bf16 %v170_v9, %v169_v8  ;;  %v146_v12 = vld [vmem:[#allocation5 + $0xe8] sm:$0xff]  ;;  %v129_v14 = vld [vmem:[#allocation5 + $0x60] sm:$0xff]  ;;  %v172_v18 = vld [vmem:[#allocation5 + $0x1b8] sm:$0xff] }
  0x38   :  { %v397_v13 = vpack.c.bf16 %v146_v12, %v145_v11  ;;  %v130_v15 = vld [vmem:[#allocation5 + $0x68] sm:$0xff]  ;;  %v439_v19 = vpack.c.bf16 %v172_v18, %v171_v16  ;;  %v147_v20 = vld [vmem:[#allocation5 + $0xf0] sm:$0xff]  ;;  %v148_v21 = vld [vmem:[#allocation5 + $0xf8] sm:$0xff] }
  0x39   :  { %388 = vmatpush3.bf16.msra.mxu0 %v387_v44  ;;  %v399_v17 = vpack.c.bf16 %v130_v15, %v129_v14  ;;  %v401_v22 = vpack.c.bf16 %v148_v21, %v147_v20  ;;  %v131_v23 = vld [vmem:[#allocation5 + $0x70] sm:$0xff]  ;;  %v132_v24 = vld [vmem:[#allocation5 + $0x78] sm:$0xff]  ;;  %v173_v26 = vld [vmem:[#allocation5 + $0x1c0] sm:$0xff] }
  0x3a   :  { %419 = vmatpush1.bf16.msra.mxu1 %v418_v42  ;;  %390 = vmatprep.subr.bf16.mxu0 %v389_v46  ;;  %v403_v25 = vpack.c.bf16 %v132_v24, %v131_v23  ;;  %v174_v27 = vld [vmem:[#allocation5 + $0x1c8] sm:$0xff]  ;;  %v175_v31 = vld [vmem:[#allocation5 + $0x1d0] sm:$0xff]  ;;  %v176_v32 = vld [vmem:[#allocation5 + $0x1d8] sm:$0xff] }
  0x3b   :  { %420 = vmatprep.subr.bf16.mxu1 %v545_v7  ;;  %v442_v28 = vpack.c.bf16 %v174_v27, %v173_v26  ;;  %v445_v34 = vpack.c.bf16 %v176_v32, %v175_v31 }
  0x3d   :  { %392 = vmatpush3.bf16.msra.mxu0 %v391_v53 }
  0x3e   :  { %422 = vmatpush1.bf16.msra.mxu1 %v421_v51  ;;  %394 = vmatprep.subr.bf16.mxu0 %v393_v55 }
  0x3f   :  { %423 = vmatprep.subr.bf16.mxu1 %v545_v7 }
  0x41   :  { %396 = vmatpush3.bf16.msra.mxu0 %v395_v59 }
  0x42   :  { %425 = vmatpush1.bf16.msra.mxu1 %v424_v58  ;;  %398 = vmatprep.subr.bf16.mxu0 %v397_v13 }
  0x43   :  { %426 = vmatprep.subr.bf16.mxu1 %v545_v7 }
  0x45   :  { %400 = vmatpush3.bf16.msra.mxu0 %v399_v17 }
  0x46   :  { %428 = vmatpush1.bf16.msra.mxu1 %v427_v62  ;;  %402 = vmatprep.subr.bf16.mxu0 %v401_v22 }
  0x47   :  { %429 = vmatprep.subr.bf16.mxu1 %v545_v7 }
  0x49   :  { %404 = vmatpush3.bf16.msra.mxu0 %v403_v25 }
  0x4a   :  { %431 = vmatpush1.bf16.msra.mxu1 %v430_v3 }
  0x4b   :  { %432 = vmatprep.subr.bf16.mxu1 %v545_v7 }
  0x4e   :  { %434 = vmatpush1.bf16.msra.mxu1 %v433_v6 }
  0x4f   :  { %435 = vmatprep.subr.bf16.mxu1 %v545_v7 }
  0x52   :  { %437 = vmatpush1.bf16.msra.mxu1 %v436_v10 }
  0x53   :  { %438 = vmatprep.subr.bf16.mxu1 %v545_v7 }
  0x56   :  { %440 = vmatpush1.bf16.msra.mxu1 %v439_v19 }
  0x57   :  { %441 = vmatprep.subr.bf16.mxu1 %v545_v7 }
  0x5a   :  { %443 = vmatpush1.bf16.msra.mxu1 %v442_v28 }
  0x5b   :  { %444 = vmatprep.subr.bf16.mxu1 %v545_v7 }
  0x5e   :  { %446 = vmatpush1.bf16.msra.mxu1 %v445_v34 }
  0x99   :  { %v60_v29 = vpop.permute.xlu1 %59  ;;  %v46_v30 = vpop.permute.xlu0 %45 }
  0x9a   :  { %v48_v33 = vmul.f32 %v46_v30, %v595_v1  ;;  %v62_v38 = vmul.f32 %v60_v29, %v595_v1 }
  0x9c   :  { %69 = vrot.lane.b32.xlu0 %v48_v33, %s542_s6 }
  0x9d   :  { %v42_v36 = vpop.permute.xlu1 %41  ;;  %v50_v37 = vpop.permute.xlu0 %49 }
  0x9e   :  { %v44_v39 = vmul.f32 %v42_v36, %v595_v1  ;;  %v52_v40 = vmul.f32 %v50_v37, %v595_v1 }
  0xa0   :  { %v456_v7 = vpack.i.bf16 %v62_v38, %v52_v40  ;;  %v461_v41 = vpack.i.bf16 %v44_v39, %v53_v35 }
  0xa1   :  { %v56_v42 = vpop.permute.xlu0 %55  ;;  %v64_v43 = vpop.permute.xlu1 %63 }
  0xa2   :  { %457 = vrot.lane.b32.xlu1 %v456_v7, %s543_s7  ;;  %462 = vrot.lane.b32.xlu0 %v461_v41, %s544_s1  ;;  %v66_v44 = vmul.f32 %v64_v43, %v595_v1  ;;  %v58_v45 = vmul.f32 %v56_v42, %v595_v1  ;;  %v67_v46 = vmul.f32 %v56_v42, %v593_v0 }
  0xa4   :  { %v109_v48 = vsel %vm103_vm0, %v58_v45, %v44_v39 }
  0xa6   :  { %92 = vrot.lane.b32.xlu1 %v58_v45, %s542_s6  ;;  %96 = vrot.lane.b32.xlu0 %v66_v44, %s543_s7 }
  0xaa   :  { %100 = vrot.lane.b32.xlu1 %v67_v46, %s543_s7  ;;  %88 = vrot.lane.b32.xlu0 %v62_v38, %s542_s6 }
 0x10e   :  { %v70_v47 = vpop.permute.xlu0 %69 }
 0x10f   :  { %v104_v54 = vsel %vm103_vm0, %v44_v39, %v70_v47  ;;  %v110_v0 = vsel %vm105_vm1, %v109_v48, %v70_v47 }
 0x114   :  { %v458_v49 = vpop.permute.xlu1 %457  ;;  %v463_v50 = vpop.permute.xlu0 %462 }
 0x115   :  { %v460_v51 = vunpack.i.h.bf16 %v458_v49  ;;  %v459_v1 = vunpack.i.l.bf16 %v458_v49  ;;  %v465_v52 = vunpack.i.h.bf16 %v463_v50  ;;  %v464_v53 = vunpack.i.l.bf16 %v463_v50 }
 0x117   :  { %v111_v55 = vsel %vm107_vm2, %v110_v0, %v460_v51  ;;  %v106_v56 = vsel %vm105_vm1, %v104_v54, %v459_v1  ;;  %v112_v60 = vsel %vm103_vm0, %v464_v53, %v465_v52 }
 0x118   :  { %v93_v57 = vpop.permute.xlu1 %92  ;;  %244 = vmatprep.mubr.f32.mxu0 %v111_v55  ;;  %v97_v58 = vpop.permute.xlu0 %96  ;;  %v108_v59 = vsel %vm107_vm2, %v106_v56, %v464_v53  ;;  %v113_v2 = vsel %vm105_vm1, %v112_v60, %v66_v44 }
 0x119   :  { %245 = vmatmul.mubr.f32.vlgmr.msra.gmra.mrb[0].mxu0 %v108_v59  ;;  %v115_v61 = vsel %vm103_vm0, %v93_v57, %v97_v58 }
 0x11c   :  { %v101_v62 = vpop.permute.xlu1 %100  ;;  %v89_v63 = vpop.permute.xlu0 %88 }
 0x11d   :  { %v116_v3 = vsel %vm105_vm1, %v115_v61, %v101_v62  ;;  %v114_v4 = vsel %vm107_vm2, %v113_v2, %v89_v63 }
 0x11e   :  { %337 = vmatprep.mubr.msk.f32.mxu1 %vm107_vm2, %v116_v3 }
 0x11f   :  { %315 = vmatmul.mubr.f32.vlgmr.msra.gmra.mrb[0].mxu1 %v114_v4 }
 0x1ec   :  { %v370_v5 = vpop.f32.mrb[0].mxu0 }
 0x1ed   :  { %v371_v6 = vpop.f32.mrb[1].mxu0 }
 0x1ee   :  { %v372_v8 = vadd.f32 %v371_v6, %v370_v5 }
 0x1f2   :  { %v316_v9 = vpop.f32.mrb[0].mxu1 }
 0x1f3   :  { %v317_v10 = vadd.f32 %v372_v8, %v316_v9  ;;  %v318_v11 = vpop.f32.mrb[1].mxu1 }
 0x1f5   :  { %320 = vst [vmem:[#allocation7] sm:$0xff] %v317_v10 }
 0x1f6   :  { %521 = shalt.err (!%p518_p6)
}
 0x1f7   :  { %s522_s13 = scalar_lea.hbm %s665_s2, 128 }
 0x1f8   :  { %p523_p7 = scmp.ne.s32.totalorder %s665_s2, %s522_s13  ;;  %p526_p8 = scmp.lt.u32.totalorder %s522_s13, %s665_s2 }
 0x1fa   :  { %p528_p9 = pnand %p526_p8, %p523_p7 }
 0x1fc   :  { %531 = shalt.err (!%p528_p9)
}
 0x1fd   :  { %330 = dma.vmem_to_hbm [thread:$0]  %s328_s9, 128, %s665_s2, [#allocation4]  }
 0x1fe   :  { %536 = dma.done.wait [#allocation4], 128  }
 0x1ff   :  { %537 = vsyncadd [#allocation4], 4294967168 }
 0x200   :  { %334 = vsyncpa [#allocation3], 1 }
 0x201   :  { %335 = vsyncpa [#allocation6], 1 }
 0x202   :  { %336 = vsyncpa [#allocation4], 1 }

</bundles_post_ra>
